<compile_context>
chip_gen: v6e
topology: v6e:2x2x1
jax: 0.10.0
libtpu: 0.0.40
codegen_flags: <defaults>
</compile_context>

<pallas_src>
import functools

import jax
import jax.numpy as jnp
from jax.experimental import pallas as pl
from jax.experimental.pallas import tpu as pltpu

IN, H1, H2, OUT = 784, 64, 32, 10
H1_PAD, H2_PAD, OUT_PAD = 128, 128, 128     # lane-dense feature dims
NEG_BIG = -1.0e30                           # mask for padded logit lanes (exp -> 0)


def mlp_kernel(x_ref, w1_ref, b1_ref, w2_ref, b2_ref, w3_ref, b3_ref, o_ref):
    # Layer 1: x (tb, 784) f32 -> bf16 on-chip, MXU matmul with f32 accumulate.
    x = x_ref[...].astype(jnp.bfloat16)
    h1 = jnp.dot(x, w1_ref[...], preferred_element_type=jnp.float32)
    h1 = jnp.maximum(h1 + b1_ref[...], 0.0)

    # Layer 2.
    h2 = jnp.dot(h1.astype(jnp.bfloat16), w2_ref[...],
                 preferred_element_type=jnp.float32)
    h2 = jnp.maximum(h2 + b2_ref[...], 0.0)

    # Layer 3: logits.  Padded class lanes get NEG_BIG from the padded bias,
    # so no in-kernel masking is needed for the softmax below.
    z = jnp.dot(h2.astype(jnp.bfloat16), w3_ref[...],
                preferred_element_type=jnp.float32)
    z = z + b3_ref[...]

    # log_softmax over the lane axis: padded lanes contribute exp(~-inf) = 0.
    m = jnp.max(z, axis=-1, keepdims=True)
    lse = m + jnp.log(jnp.sum(jnp.exp(z - m), axis=-1, keepdims=True))
    o_ref[...] = (z - lse).astype(o_ref.dtype)


def _pad2(a, rows, cols, dtype, fill=0.0):
    a = a.astype(dtype)
    return jnp.pad(a, ((0, rows - a.shape[0]), (0, cols - a.shape[1])),
                   constant_values=fill)


@functools.partial(jax.jit, static_argnames=("tile_b",))
def mlp_forward(x, w1, b1, w2, b2, w3, b3, tile_b=256):
    """x: (B, 784) f32.  Weights/biases in PyTorch nn.Linear layout:
       w1 (64,784)  b1 (64,)   w2 (32,64)  b2 (32,)   w3 (10,32)  b3 (10,)
       Returns (B, 10) f32 log-probabilities."""
    B = x.shape[0]

    # Batch tile: 256-row tiles for large B, else a single 8-aligned tile.
    tb = tile_b if B >= tile_b else ((B + 7) // 8) * 8
    B_pad = pl.cdiv(B, tb) * tb

    # x stays f32 and K stays 784 (full dim): only pad the batch if needed.
    x_p = x if B_pad == B else jnp.pad(x, ((0, B_pad - B), (0, 0)))

    # Lane-dense bf16 weights; f32 biases (b3 padded with NEG_BIG = class mask).
    w1_p = _pad2(w1.T, IN, H1_PAD, jnp.bfloat16)        # (784, 128)
    w2_p = _pad2(w2.T, H1_PAD, H2_PAD, jnp.bfloat16)    # (128, 128)
    w3_p = _pad2(w3.T, H2_PAD, OUT_PAD, jnp.bfloat16)   # (128, 128)
    b1_p = _pad2(b1.reshape(1, -1), 1, H1_PAD, jnp.float32)
    b2_p = _pad2(b2.reshape(1, -1), 1, H2_PAD, jnp.float32)
    b3_p = _pad2(b3.reshape(1, -1), 1, OUT_PAD, jnp.float32, fill=NEG_BIG)

    out = pl.pallas_call(
        mlp_kernel,
        out_shape=jax.ShapeDtypeStruct((B_pad, OUT_PAD), jnp.float32),
        grid_spec=pltpu.PrefetchScalarGridSpec(
            num_scalar_prefetch=0,
            grid=(B_pad // tb,),
            in_specs=[
                pl.BlockSpec((tb, IN), lambda i: (i, 0)),        # x: streamed per tile
                pl.BlockSpec((IN, H1_PAD), lambda i: (0, 0)),    # weights stay resident
                pl.BlockSpec((1, H1_PAD), lambda i: (0, 0)),
                pl.BlockSpec((H1_PAD, H2_PAD), lambda i: (0, 0)),
                pl.BlockSpec((1, H2_PAD), lambda i: (0, 0)),
                pl.BlockSpec((H2_PAD, OUT_PAD), lambda i: (0, 0)),
                pl.BlockSpec((1, OUT_PAD), lambda i: (0, 0)),
            ],
            out_specs=pl.BlockSpec((tb, OUT_PAD), lambda i: (i, 0)),
        ),
        compiler_params=pltpu.CompilerParams(
            dimension_semantics=("parallel",),   # independent batch tiles -> megacore
        ),
    )(x_p, w1_p, b1_p, w2_p, b2_p, w3_p, b3_p)

    return out[:B, :OUT]


if __name__ == "__main__":
    key = jax.random.PRNGKey(0)
    kx, k1, k2, k3, k4, k5, k6 = jax.random.split(key, 7)

    B = 8

    def init_linear(kw, kb, fan_in, fan_out):
        bound = 1.0 / (fan_in ** 0.5)
        w = jax.random.uniform(kw, (fan_out, fan_in), jnp.float32, -bound, bound)
        b = jax.random.uniform(kb, (fan_out,), jnp.float32, -bound, bound)
        return w, b

    w1, b1 = init_linear(k1, k2, IN, H1)   # (64, 784), (64,)
    w2, b2 = init_linear(k3, k4, H1, H2)   # (32, 64),  (32,)
    w3, b3 = init_linear(k5, k6, H2, OUT)  # (10, 32),  (10,)

    x = jax.random.normal(kx, (B, IN), jnp.float32)

    y = mlp_forward(x, w1, b1, w2, b2, w3, b3)
    y = jax.block_until_ready(y)

    # Pure-JAX f32 reference (same math as the PyTorch module).
    h = jnp.maximum(x @ w1.T + b1, 0.0)
    h = jnp.maximum(h @ w2.T + b2, 0.0)
    z = h @ w3.T + b3
    y_ref = jax.nn.log_softmax(z, axis=1)

    assert y.shape == (B, OUT)
    # bf16 matmuls with f32 accumulation -> slightly looser tolerance vs f32 ref.
    assert jnp.allclose(y, y_ref, atol=3e-2, rtol=3e-2)
    # log-probs must exponentiate to a valid distribution over 10 classes.
    assert jnp.allclose(jnp.sum(jnp.exp(y), axis=1), 1.0, atol=1e-3)

    print("KERNEL_OK")
</pallas_src>

<mosaic_0001>
module attributes {stable_mosaic.version = 11 : i64} {
  func.func @mlp_kernel(%arg0: i32, %arg1: memref<8x784xf32, #tpu.memory_space<vmem>>, %arg2: memref<784x128xbf16, #tpu.memory_space<vmem>>, %arg3: memref<1x128xf32, #tpu.memory_space<vmem>>, %arg4: memref<128x128xbf16, #tpu.memory_space<vmem>>, %arg5: memref<1x128xf32, #tpu.memory_space<vmem>>, %arg6: memref<128x128xbf16, #tpu.memory_space<vmem>>, %arg7: memref<1x128xf32, #tpu.memory_space<vmem>>, %arg8: memref<8x128xf32, #tpu.memory_space<vmem>>) attributes {dimension_semantics = [#tpu.dimension_semantics<parallel>], iteration_bounds = array<i64: 1>, scalar_prefetch = 0 : i64, scratch_operands = 0 : i64, tpu.core_type = #tpu.core_type<tc>, window_params = [{transform_indices = @transform_0, window_bounds = array<i64: 8, 784>}, {pipeline_mode = #tpu.pipeline_mode<synchronous>, transform_indices = @transform_1, window_bounds = array<i64: 784, 128>}, {pipeline_mode = #tpu.pipeline_mode<synchronous>, transform_indices = @transform_2, window_bounds = array<i64: 1, 128>}, {pipeline_mode = #tpu.pipeline_mode<synchronous>, transform_indices = @transform_3, window_bounds = array<i64: 128, 128>}, {pipeline_mode = #tpu.pipeline_mode<synchronous>, transform_indices = @transform_4, window_bounds = array<i64: 1, 128>}, {pipeline_mode = #tpu.pipeline_mode<synchronous>, transform_indices = @transform_5, window_bounds = array<i64: 128, 128>}, {pipeline_mode = #tpu.pipeline_mode<synchronous>, transform_indices = @transform_6, window_bounds = array<i64: 1, 128>}, {transform_indices = @transform_7, window_bounds = array<i64: 8, 128>}]} {
    %c0 = arith.constant 0 : index
    %c0_0 = arith.constant 0 : index
    %0 = vector.load %arg1[%c0, %c0_0] : memref<8x784xf32, #tpu.memory_space<vmem>>, vector<8x784xf32>
    %1 = arith.truncf %0 : vector<8x784xf32> to vector<8x784xbf16>
    %c0_1 = arith.constant 0 : index
    %c0_2 = arith.constant 0 : index
    %2 = vector.load %arg2[%c0_1, %c0_2] : memref<784x128xbf16, #tpu.memory_space<vmem>>, vector<784x128xbf16>
    %cst = arith.constant dense<0.000000e+00> : vector<8x128xf32>
    %3 = tpu.matmul %1, %2, %cst {dimension_numbers = #tpu.dot_dimension_numbers<[1], [0], [0], [1], [0, 0, 1, 1], [], []>} : vector<8x784xbf16>, vector<784x128xbf16>, vector<8x128xf32> -> vector<8x128xf32>
    %c0_3 = arith.constant 0 : index
    %c0_4 = arith.constant 0 : index
    %4 = vector.load %arg3[%c0_3, %c0_4] : memref<1x128xf32, #tpu.memory_space<vmem>>, vector<1x128xf32>
    %5 = vector.broadcast %4 : vector<1x128xf32> to vector<8x128xf32>
    %6 = arith.addf %3, %5 : vector<8x128xf32>
    %cst_5 = arith.constant 0.000000e+00 : f32
    %7 = vector.broadcast %cst_5 : f32 to vector<8x128xf32>
    %8 = arith.maximumf %6, %7 : vector<8x128xf32>
    %9 = arith.truncf %8 : vector<8x128xf32> to vector<8x128xbf16>
    %c0_6 = arith.constant 0 : index
    %c0_7 = arith.constant 0 : index
    %10 = vector.load %arg4[%c0_6, %c0_7] : memref<128x128xbf16, #tpu.memory_space<vmem>>, vector<128x128xbf16>
    %cst_8 = arith.constant dense<0.000000e+00> : vector<8x128xf32>
    %11 = tpu.matmul %9, %10, %cst_8 {dimension_numbers = #tpu.dot_dimension_numbers<[1], [0], [0], [1], [0, 0, 1, 1], [], []>} : vector<8x128xbf16>, vector<128x128xbf16>, vector<8x128xf32> -> vector<8x128xf32>
    %c0_9 = arith.constant 0 : index
    %c0_10 = arith.constant 0 : index
    %12 = vector.load %arg5[%c0_9, %c0_10] : memref<1x128xf32, #tpu.memory_space<vmem>>, vector<1x128xf32>
    %13 = vector.broadcast %12 : vector<1x128xf32> to vector<8x128xf32>
    %14 = arith.addf %11, %13 : vector<8x128xf32>
    %cst_11 = arith.constant 0.000000e+00 : f32
    %15 = vector.broadcast %cst_11 : f32 to vector<8x128xf32>
    %16 = arith.maximumf %14, %15 : vector<8x128xf32>
    %17 = arith.truncf %16 : vector<8x128xf32> to vector<8x128xbf16>
    %c0_12 = arith.constant 0 : index
    %c0_13 = arith.constant 0 : index
    %18 = vector.load %arg6[%c0_12, %c0_13] : memref<128x128xbf16, #tpu.memory_space<vmem>>, vector<128x128xbf16>
    %cst_14 = arith.constant dense<0.000000e+00> : vector<8x128xf32>
    %19 = tpu.matmul %17, %18, %cst_14 {dimension_numbers = #tpu.dot_dimension_numbers<[1], [0], [0], [1], [0, 0, 1, 1], [], []>} : vector<8x128xbf16>, vector<128x128xbf16>, vector<8x128xf32> -> vector<8x128xf32>
    %c0_15 = arith.constant 0 : index
    %c0_16 = arith.constant 0 : index
    %20 = vector.load %arg7[%c0_15, %c0_16] : memref<1x128xf32, #tpu.memory_space<vmem>>, vector<1x128xf32>
    %21 = vector.broadcast %20 : vector<1x128xf32> to vector<8x128xf32>
    %22 = arith.addf %19, %21 : vector<8x128xf32>
    %cst_17 = arith.constant dense<0xFF800000> : vector<8xf32>
    %23 = vector.multi_reduction <maximumf>, %22, %cst_17 [1] : vector<8x128xf32> to vector<8xf32>
    %24 = vector.shape_cast %23 : vector<8xf32> to vector<8x1xf32>
    %25 = vector.broadcast %24 : vector<8x1xf32> to vector<8x128xf32>
    %26 = arith.subf %22, %25 : vector<8x128xf32>
    %27 = math.exp %26 : vector<8x128xf32>
    %cst_18 = arith.constant dense<0.000000e+00> : vector<8xf32>
    %28 = vector.multi_reduction <add>, %27, %cst_18 [1] : vector<8x128xf32> to vector<8xf32>
    %29 = vector.shape_cast %28 : vector<8xf32> to vector<8x1xf32>
    %30 = math.log %29 : vector<8x1xf32>
    %31 = arith.addf %24, %30 : vector<8x1xf32>
    %32 = vector.broadcast %31 : vector<8x1xf32> to vector<8x128xf32>
    %33 = arith.subf %22, %32 : vector<8x128xf32>
    %c0_19 = arith.constant 0 : index
    %c0_20 = arith.constant 0 : index
    %34 = vector.load %arg8[%c0_19, %c0_20] : memref<8x128xf32, #tpu.memory_space<vmem>>, vector<8x128xf32>
    tpu.vector_store %arg8[%c0_19, %c0_20], %33 {strides = array<i32>} : memref<8x128xf32, #tpu.memory_space<vmem>>, vector<8x128xf32>,
    return
  }
  func.func @transform_0(%arg0: i32) -> (i32, i32) {
    %c0_i32 = arith.constant 0 : i32
    %c0_i32_0 = arith.constant 0 : i32
    return %arg0, %c0_i32 : i32, i32
  }
  func.func @transform_1(%arg0: i32) -> (i32, i32) {
    %c0_i32 = arith.constant 0 : i32
    %c0_i32_0 = arith.constant 0 : i32
    %c0_i32_1 = arith.constant 0 : i32
    return %c0_i32, %c0_i32_0 : i32, i32
  }
  func.func @transform_2(%arg0: i32) -> (i32, i32) {
    %c0_i32 = arith.constant 0 : i32
    %c0_i32_0 = arith.constant 0 : i32
    %c0_i32_1 = arith.constant 0 : i32
    return %c0_i32, %c0_i32_0 : i32, i32
  }
  func.func @transform_3(%arg0: i32) -> (i32, i32) {
    %c0_i32 = arith.constant 0 : i32
    %c0_i32_0 = arith.constant 0 : i32
    %c0_i32_1 = arith.constant 0 : i32
    return %c0_i32, %c0_i32_0 : i32, i32
  }
  func.func @transform_4(%arg0: i32) -> (i32, i32) {
    %c0_i32 = arith.constant 0 : i32
    %c0_i32_0 = arith.constant 0 : i32
    %c0_i32_1 = arith.constant 0 : i32
    return %c0_i32, %c0_i32_0 : i32, i32
  }
  func.func @transform_5(%arg0: i32) -> (i32, i32) {
    %c0_i32 = arith.constant 0 : i32
    %c0_i32_0 = arith.constant 0 : i32
    %c0_i32_1 = arith.constant 0 : i32
    return %c0_i32, %c0_i32_0 : i32, i32
  }
  func.func @transform_6(%arg0: i32) -> (i32, i32) {
    %c0_i32 = arith.constant 0 : i32
    %c0_i32_0 = arith.constant 0 : i32
    %c0_i32_1 = arith.constant 0 : i32
    return %c0_i32, %c0_i32_0 : i32, i32
  }
  func.func @transform_7(%arg0: i32) -> (i32, i32) {
    %c0_i32 = arith.constant 0 : i32
    %c0_i32_0 = arith.constant 0 : i32
    return %arg0, %c0_i32 : i32, i32
  }
}

</mosaic_0001>

<bundles_post_ra>
// kernel: mlp_forward.1
= control target key start
LH: loop header
LB: loop body
LE: loop exit
PB: predicated region body
PF: predicated region fallthrough
CT: control target
= control target key end

     0   :  { %v1152_v44 = vmov 0.0   ;;  %vm1153_vm0 = vmmov 0   ;;  %vm441_vm1 = vcmask 130048   ;;  %s1446_s0 = inlined_call_operand.vmem [shape: f32[8,784], index: 0, kind: input, shape index: {}]   ;;  %s1447_s1 = inlined_call_operand.vmem [shape: bf16[784,128], index: 1, kind: input, shape index: {}]   ;;  %s1448_s2 = inlined_call_operand.vmem [shape: f32[1,128], index: 2, kind: input, shape index: {}]   ;;  %s1449_s3 = inlined_call_operand.vmem [shape: bf16[128,128], index: 3, kind: input, shape index: {}]   ;;  %s1450_s4 = inlined_call_operand.vmem [shape: f32[1,128], index: 4, kind: input, shape index: {}]   ;;  %s1451_s5 = inlined_call_operand.vmem [shape: bf16[128,128], index: 5, kind: input, shape index: {}]   ;;  %s1452_s6 = inlined_call_operand.vmem [shape: f32[1,128], index: 6, kind: input, shape index: {}]   ;;  %s1453_s7 = inlined_call_operand.hbm [shape: f32[8,128], index: 7, kind: output, shape index: {}]  }
   0x1   :  { %v1061_v0 = vld [vmem:[%s1447_s1 + $0x78] sm:$0xff]   ;;  %v1065_v4 = vld [vmem:[%s1447_s1 + $0x70] sm:$0xff]   ;;  %v1069_v8 = vld [vmem:[%s1447_s1 + $0x68] sm:$0xff]  }
   0x2   :  { %v1062_v1 = vld [vmem:[%s1447_s1 + $0x38] sm:$0xff]   ;;  %926 = vmatprep.subr.bf16.mxu0 %v1061_v0  ;;  %v1066_v5 = vld [vmem:[%s1447_s1 + $0x30] sm:$0xff]   ;;  %v1070_v9 = vld [vmem:[%s1447_s1 + $0x28] sm:$0xff]  }
   0x3   :  { %v1063_v2 = vld [vmem:[%s1447_s1 + $0xf8] sm:$0xff]   ;;  %927 = vmatpush3.bf16.msra.mxu0 %v1062_v1  ;;  %v1067_v6 = vld [vmem:[%s1447_s1 + $0xf0] sm:$0xff]   ;;  %v1071_v10 = vld [vmem:[%s1447_s1 + $0xe8] sm:$0xff]  }
   0x4   :  { %v1064_v3 = vld [vmem:[%s1447_s1 + $0xb8] sm:$0xff]   ;;  %948 = vmatprep.subr.bf16.mxu1 %v1063_v2  ;;  %928 = vmatprep.subr.bf16.mxu0 %v1065_v4  ;;  %v1068_v7 = vld [vmem:[%s1447_s1 + $0xb0] sm:$0xff]   ;;  %v1072_v11 = vld [vmem:[%s1447_s1 + $0xa8] sm:$0xff]  }
   0x5   :  { %949 = vmatpush3.bf16.msra.mxu1 %v1064_v3  ;;  %v1073_v12 = vld [vmem:[%s1447_s1 + $0x60] sm:$0xff]   ;;  %v1077_v16 = vld [vmem:[%s1447_s1 + $0x58] sm:$0xff]   ;;  %v1081_v20 = vld [vmem:[%s1447_s1 + $0x50] sm:$0xff]  }
   0x6   :  { %950 = vmatprep.subr.bf16.mxu1 %v1067_v6  ;;  %v1074_v13 = vld [vmem:[%s1447_s1 + $0x20] sm:$0xff]   ;;  %v1078_v17 = vld [vmem:[%s1447_s1 + $0x18] sm:$0xff]   ;;  %v1082_v21 = vld [vmem:[%s1447_s1 + $0x10] sm:$0xff]  }
   0x7   :  { %929 = vmatpush3.bf16.msra.mxu0 %v1066_v5  ;;  %v1075_v14 = vld [vmem:[%s1447_s1 + $0xe0] sm:$0xff]   ;;  %v1079_v18 = vld [vmem:[%s1447_s1 + $0xd8] sm:$0xff]   ;;  %v1083_v22 = vld [vmem:[%s1447_s1 + $0xd0] sm:$0xff]  }
   0x8   :  { %930 = vmatprep.subr.bf16.mxu0 %v1069_v8  ;;  %v1076_v15 = vld [vmem:[%s1447_s1 + $0xa0] sm:$0xff]   ;;  %v1080_v19 = vld [vmem:[%s1447_s1 + $0x98] sm:$0xff]   ;;  %v1084_v23 = vld [vmem:[%s1447_s1 + $0x90] sm:$0xff]  }
   0x9   :  { %951 = vmatpush3.bf16.msra.mxu1 %v1068_v7  ;;  %v1085_v24 = vld [vmem:[%s1447_s1 + $0x48] sm:$0xff]   ;;  %v1089_v28 = vld [vmem:[%s1447_s1 + $0x40] sm:$0xff]   ;;  %v1093_v36 = vld [vmem:[%s1447_s1 + $0x178] sm:$0xff]  }
   0xa   :  { %952 = vmatprep.subr.bf16.mxu1 %v1071_v10  ;;  %v1086_v25 = vld [vmem:[%s1447_s1 + $0x8] sm:$0xff]   ;;  %v1090_v29 = vld [vmem:[%s1447_s1] sm:$0xff]   ;;  %v31_v37 = vld [vmem:[%s1446_s0 + $0x18] sm:$0xff] }
   0xb   :  { %931 = vmatpush3.bf16.msra.mxu0 %v1070_v9  ;;  %v1087_v26 = vld [vmem:[%s1447_s1 + $0xc8] sm:$0xff]   ;;  %v1091_v30 = vld [vmem:[%s1447_s1 + $0xc0] sm:$0xff]   ;;  %v38_v38 = vpack.c.bf16 %v31_v37, %v31_v37  ;;  %v1094_v39 = vld [vmem:[%s1447_s1 + $0x138] sm:$0xff]  }
   0xc   :  { %932 = vmatprep.subr.bf16.mxu0 %v1073_v12  ;;  %v1088_v27 = vld [vmem:[%s1447_s1 + $0x88] sm:$0xff]   ;;  %v1092_v33 = vld [vmem:[%s1447_s1 + $0x80] sm:$0xff]   ;;  %v30_v40 = vld [vmem:[%s1446_s0 + $0x10] sm:$0xff] }
   0xd   :  { %953 = vmatpush3.bf16.msra.mxu1 %v1072_v11  ;;  %v29_v31 = vld [vmem:[%s1446_s0 + $0x8] sm:$0xff]  ;;  %v28_v34 = vld [vmem:[%s1446_s0] sm:$0xff]  ;;  %517 = vmatprep.mubr.bf16.mxu1 %v38_v38  ;;  %v37_v41 = vpack.c.bf16 %v30_v40, %v30_v40  ;;  %v1095_v42 = vld [vmem:[%s1447_s1 + $0x170] sm:$0xff]  }
   0xe   :  { %954 = vmatprep.subr.bf16.mxu1 %v1075_v14  ;;  %v36_v32 = vpack.c.bf16 %v29_v31, %v29_v31  ;;  %v35_v35 = vpack.c.bf16 %v28_v34, %v28_v34  ;;  %v1096_v43 = vld [vmem:[%s1447_s1 + $0x130] sm:$0xff]   ;;  %v1097_v45 = vld [vmem:[%s1447_s1 + $0x168] sm:$0xff]   ;;  %v1099_v47 = vld [vmem:[%s1447_s1 + $0x160] sm:$0xff]  }
   0xf   :  { %933 = vmatpush3.bf16.msra.mxu0 %v1074_v13  ;;  %v1098_v46 = vld [vmem:[%s1447_s1 + $0x128] sm:$0xff]   ;;  %v1100_v48 = vld [vmem:[%s1447_s1 + $0x120] sm:$0xff]   ;;  %v1101_v49 = vld [vmem:[%s1447_s1 + $0x158] sm:$0xff]  }
  0x10   :  { %934 = vmatprep.subr.bf16.mxu0 %v1077_v16  ;;  %477 = vmatprep.mubr.bf16.mxu0 %v36_v32  ;;  %v1102_v50 = vld [vmem:[%s1447_s1 + $0x118] sm:$0xff]   ;;  %v1103_v51 = vld [vmem:[%s1447_s1 + $0x150] sm:$0xff]   ;;  %v1109_v53 = vld [vmem:[%s1447_s1 + $0x180] sm:$0xff]  }
  0x11   :  { %955 = vmatpush3.bf16.msra.mxu1 %v1076_v15  ;;  %v1104_v52 = vld [vmem:[%s1447_s1 + $0x110] sm:$0xff]   ;;  %v33_v54 = vld [vmem:[%s1446_s0 + $0x28] sm:$0xff]  ;;  %v1107_v60 = vld [vmem:[%s1447_s1 + $0x140] sm:$0xff]  }
  0x12   :  { %956 = vmatprep.subr.bf16.mxu1 %v1079_v18  ;;  %v1105_v55 = vld [vmem:[%s1447_s1 + $0x148] sm:$0xff]   ;;  %v40_v56 = vpack.c.bf16 %v33_v54, %v33_v54  ;;  %v34_v57 = vld [vmem:[%s1446_s0 + $0x30] sm:$0xff]  ;;  %v1108_v61 = vld [vmem:[%s1447_s1 + $0x100] sm:$0xff]  }
  0x13   :  { %935 = vmatpush3.bf16.msra.mxu0 %v1078_v17  ;;  %v41_v58 = vpack.c.bf16 %v34_v57, %v34_v57  ;;  %v1106_v59 = vld [vmem:[%s1447_s1 + $0x108] sm:$0xff]   ;;  %v32_v62 = vld [vmem:[%s1446_s0 + $0x20] sm:$0xff] }
  0x14   :  { %936 = vmatprep.subr.bf16.mxu0 %v1081_v20 }
  0x15   :  { %957 = vmatpush3.bf16.msra.mxu1 %v1080_v19 }
  0x16   :  { %958 = vmatprep.subr.bf16.mxu1 %v1083_v22 }
  0x17   :  { %937 = vmatpush3.bf16.msra.mxu0 %v1082_v21 }
  0x18   :  { %938 = vmatprep.subr.bf16.mxu0 %v1085_v24 }
  0x19   :  { %959 = vmatpush3.bf16.msra.mxu1 %v1084_v23 }
  0x1a   :  { %960 = vmatprep.subr.bf16.mxu1 %v1087_v26 }
  0x1b   :  { %939 = vmatpush3.bf16.msra.mxu0 %v1086_v25 }
  0x1c   :  { %940 = vmatprep.subr.bf16.mxu0 %v1089_v28 }
  0x1d   :  { %961 = vmatpush3.bf16.msra.mxu1 %v1088_v27 }
  0x1e   :  { %962 = vmatprep.subr.bf16.mxu1 %v1091_v30 }
  0x1f   :  { %941 = vmatpush3.bf16.msra.mxu0 %v1090_v29 }
  0x20   :  { %970 = vmatprep.subr.bf16.mxu0 %v1093_v36 }
  0x21   :  { %963 = vmatpush3.bf16.msra.mxu1 %v1092_v33 }
  0x22   :  { %478 = vmatmul.mubr.bf16.vlgmr.msra.gmra.mxu0 %v35_v35  ;;  %1012 = vmatprep.subr.bf16.mxu1 %v1152_v44 }
  0x23   :  { %971 = vmatpush3.bf16.msra.mxu0 %v1094_v39  ;;  %557 = vmatprep.mubr.bf16.mxu0 %v40_v56 }
  0x24   :  { %518 = vmatmul.mubr.bf16.vlgmr.msra.gmra.mxu1 %v37_v41  ;;  %972 = vmatprep.subr.bf16.mxu0 %v1095_v42 }
  0x25   :  { %1014 = vmatprep.mubr.msk.bf16.mxu1 %vm1153_vm0, %v1152_v44  ;;  %1013 = vmatpush3.bf16.msra.mxu1 %v1109_v53 }
  0x26   :  { %1018 = vmatprep.subr.bf16.mxu1 %v1152_v44 }
  0x27   :  { %973 = vmatpush3.bf16.msra.mxu0 %v1096_v43 }
  0x28   :  { %974 = vmatprep.subr.bf16.mxu0 %v1097_v45 }
  0x2b   :  { %975 = vmatpush3.bf16.msra.mxu0 %v1098_v46 }
  0x2c   :  { %976 = vmatprep.subr.bf16.mxu0 %v1099_v47  ;;  %1015 = vmatmul.mubr.msk.bf16.vlgmr.msra.gmra.mxu1 %vm441_vm1, %v41_v58 }
  0x2d   :  { %1034 = vmatprep.mubr.msk.bf16.mxu1 %vm1153_vm0, %v1152_v44 }
  0x2f   :  { %977 = vmatpush3.bf16.msra.mxu0 %v1100_v48 }
  0x30   :  { %978 = vmatprep.subr.bf16.mxu0 %v1101_v49 }
  0x33   :  { %979 = vmatpush3.bf16.msra.mxu0 %v1102_v50 }
  0x34   :  { %980 = vmatprep.subr.bf16.mxu0 %v1103_v51 }
  0x37   :  { %981 = vmatpush3.bf16.msra.mxu0 %v1104_v52 }
  0x38   :  { %982 = vmatprep.subr.bf16.mxu0 %v1105_v55 }
  0x3b   :  { %983 = vmatpush3.bf16.msra.mxu0 %v1106_v59 }
  0x3c   :  { %984 = vmatprep.subr.bf16.mxu0 %v1107_v60 }
  0x3d   :  { %12 = vsyncpa [#allocation3], 0  ;;  %v39_v63 = vpack.c.bf16 %v32_v62, %v32_v62  ;;  %v1110_v0 = vld [vmem:[%s1449_s3 + $0x38] sm:$0xff]   ;;  %v1111_v1 = vld [vmem:[%s1449_s3 + $0x30] sm:$0xff]  }
  0x3e   :  { %1019 = vmatpush3.bf16.msra.mxu1 %v1110_v0  ;;  %v1112_v2 = vld [vmem:[%s1449_s3 + $0x28] sm:$0xff]   ;;  %v1113_v3 = vld [vmem:[%s1449_s3 + $0x20] sm:$0xff]   ;;  %v1114_v4 = vld [vmem:[%s1449_s3 + $0x18] sm:$0xff]  }
  0x3f   :  { %985 = vmatpush3.bf16.msra.mxu0 %v1108_v61  ;;  %1020 = vmatprep.subr.bf16.mxu1 %v1152_v44  ;;  %v1115_v5 = vld [vmem:[%s1449_s3 + $0x10] sm:$0xff]   ;;  %v1116_v6 = vld [vmem:[%s1449_s3 + $0x8] sm:$0xff]   ;;  %v1117_v7 = vld [vmem:[%s1449_s3] sm:$0xff]  }
  0x40   :  { %1038 = vmatprep.subr.bf16.mxu0 %v1152_v44  ;;  %v1118_v8 = vld [vmem:[%s1451_s5 + $0x38] sm:$0xff]   ;;  %v1119_v9 = vld [vmem:[%s1451_s5 + $0x30] sm:$0xff]   ;;  %v1120_v10 = vld [vmem:[%s1451_s5 + $0x28] sm:$0xff]  }
  0x41   :  { %v1121_v11 = vld [vmem:[%s1451_s5 + $0x20] sm:$0xff]   ;;  %v1122_v12 = vld [vmem:[%s1451_s5 + $0x18] sm:$0xff]   ;;  %v1123_v13 = vld [vmem:[%s1451_s5 + $0x10] sm:$0xff]  }
  0x42   :  { %558 = vmatmul.mubr.bf16.vlgmr.msra.gmra.mxu0 %v39_v63  ;;  %1021 = vmatpush3.bf16.msra.mxu1 %v1111_v1  ;;  %v857_v27 = vld [vmem:[%s1448_s2] ss:$0 sm:$0xff]  ;;  %v1124_v40 = vld [vmem:[%s1451_s5 + $0x8] sm:$0xff]  }
  0x43   :  { %1054 = vmatprep.mubr.msk.bf16.mxu0 %vm1153_vm0, %v1152_v44  ;;  %1022 = vmatprep.subr.bf16.mxu1 %v1152_v44  ;;  %v1125_v41 = vld [vmem:[%s1451_s5] sm:$0xff]  }
  0x44   :  { %1039 = vmatpush3.bf16.msra.mxu0 %v1118_v8  ;;  %v908_v42 = vld [vmem:[%s1450_s4] ss:$0 sm:$0xff]  ;;  %s1154_s4 = smov [#allocation2]  }
  0x45   :  { %1040 = vmatprep.subr.bf16.mxu0 %v1152_v44  ;;  %s849_s5 = sshll.u32 %s1154_s4, 4  ;;  %s850_s5 = int_to_ptr.vmem [resolvable:$true] %s849_s5 }
  0x46   :  { %1023 = vmatpush3.bf16.msra.mxu1 %v1112_v2  ;;  %p1135_p1 = scmp.lt.s32.totalorder %s850_s5, %s850_s5 }
  0x47   :  { %1024 = vmatprep.subr.bf16.mxu1 %v1152_v44 }
  0x48   :  { %1041 = vmatpush3.bf16.msra.mxu0 %v1119_v9 }
  0x49   :  { %1042 = vmatprep.subr.bf16.mxu0 %v1152_v44 }
  0x4a   :  { %1025 = vmatpush3.bf16.msra.mxu1 %v1113_v3 }
  0x4b   :  { %1026 = vmatprep.subr.bf16.mxu1 %v1152_v44 }
  0x4c   :  { %1043 = vmatpush3.bf16.msra.mxu0 %v1120_v10 }
  0x4d   :  { %1044 = vmatprep.subr.bf16.mxu0 %v1152_v44 }
  0x4e   :  { %1027 = vmatpush3.bf16.msra.mxu1 %v1114_v4 }
  0x4f   :  { %1028 = vmatprep.subr.bf16.mxu1 %v1152_v44 }
  0x50   :  { %1045 = vmatpush3.bf16.msra.mxu0 %v1121_v11 }
  0x51   :  { %1046 = vmatprep.subr.bf16.mxu0 %v1152_v44 }
  0x52   :  { %1029 = vmatpush3.bf16.msra.mxu1 %v1115_v5 }
  0x53   :  { %1030 = vmatprep.subr.bf16.mxu1 %v1152_v44 }
  0x54   :  { %1047 = vmatpush3.bf16.msra.mxu0 %v1122_v12 }
  0x55   :  { %1048 = vmatprep.subr.bf16.mxu0 %v1152_v44 }
  0x56   :  { %1031 = vmatpush3.bf16.msra.mxu1 %v1116_v6 }
  0x57   :  { %1032 = vmatprep.subr.bf16.mxu1 %v1152_v44 }
  0x58   :  { %1049 = vmatpush3.bf16.msra.mxu0 %v1123_v13 }
  0x59   :  { %1050 = vmatprep.subr.bf16.mxu0 %v1152_v44 }
  0x5a   :  { %1033 = vmatpush3.bf16.msra.mxu1 %v1117_v7 }
  0x5c   :  { %1051 = vmatpush3.bf16.msra.mxu0 %v1124_v40 }
  0x5d   :  { %1052 = vmatprep.subr.bf16.mxu0 %v1152_v44  ;;  %v917_v44 = vld [vmem:[%s1452_s6] ss:$0 sm:$0xff]  ;;  %s1130_s6 = scalar_lea.vmem %s850_s5, 128 }
  0x5e   :  { %p1131_p0 = scmp.ne.s32.totalorder %s850_s5, %s1130_s6  ;;  %p1136_p2 = scmp.lt.s32.totalorder %s1130_s6, %s1130_s6 }
  0x60   :  { %1053 = vmatpush3.bf16.msra.mxu0 %v1125_v41  ;;  %p1137_p3 = por %p1136_p2, %p1135_p1 }
  0x62   :  { %p1138_p4 = pnand %p1137_p3, %p1131_p0 }
  0xe2   :  { %v942_v14 = vpop.f32.mrf.mxu0 }
  0xe4   :  { %v943_v15 = vpop.f32.mrf.mxu0  ;;  %v964_v16 = vpop.f32.mrf.mxu1 }
  0xe5   :  { %v944_v26 = vadd.f32 %v943_v15, %v942_v14 }
  0xe6   :  { %v945_v17 = vpop.f32.mrf.mxu0  ;;  %v965_v18 = vpop.f32.mrf.mxu1 }
  0xe7   :  { %v480_v28 = vadd.f32 %v944_v26, %v857_v27  ;;  %v966_v29 = vadd.f32 %v965_v18, %v964_v16 }
  0xe8   :  { %v946_v19 = vpop.f32.mrf.mxu0  ;;  %v967_v20 = vpop.f32.mrf.mxu1 }
  0xe9   :  { %v520_v32 = vadd.f32 %v966_v29, %v480_v28 }
  0xea   :  { %v968_v21 = vpop.f32.mrf.mxu1 }
  0xec   :  { %v599_v22 = vpop.f32.mrf.mxu1 }
  0xee   :  { %v1016_v23 = vpop.f32.mrf.mxu1 }
  0xf0   :  { %v602_v24 = vpop.f32.mrf.mxu1 }
  0xf2   :  { %v1017_v25 = vpop.f32.mrf.mxu1 }
 0x102   :  { %v986_v30 = vpop.f32.mrf.mxu0 }
 0x104   :  { %v987_v31 = vpop.f32.mrf.mxu0 }
 0x105   :  { %v988_v33 = vadd.f32 %v987_v31, %v986_v30 }
 0x106   :  { %v989_v34 = vpop.f32.mrf.mxu0 }
 0x107   :  { %v560_v35 = vadd.f32 %v988_v33, %v520_v32 }
 0x108   :  { %v990_v36 = vpop.f32.mrf.mxu0 }
 0x109   :  { %v600_v37 = vadd.f32 %v599_v22, %v560_v35 }
 0x10b   :  { %v605_v38 = vmax.f32 %v600_v37, 0.0 }
 0x10d   :  { %v606_v39 = vpack.c.bf16 %v605_v38, %v605_v38 }
 0x10f   :  { %1035 = vmatmul.mubr.bf16.vlgmr.msra.gmra.mxu1 %v606_v39 }
 0x1cf   :  { %v712_v43 = vpop.f32.mrf.mxu1 }
 0x1d0   :  { %v713_v45 = vadd.f32 %v908_v42, %v712_v43 }
 0x1d1   :  { %v1036_v46 = vpop.f32.mrf.mxu1 }
 0x1d2   :  { %v718_v47 = vmax.f32 %v713_v45, 0.0 }
 0x1d3   :  { %v715_v48 = vpop.f32.mrf.mxu1 }
 0x1d4   :  { %v719_v49 = vpack.c.bf16 %v718_v47, %v718_v47 }
 0x1d5   :  { %v1037_v50 = vpop.f32.mrf.mxu1 }
 0x1d6   :  { %1055 = vmatmul.mubr.bf16.vlgmr.msra.gmra.mxu0 %v719_v49 }
 0x296   :  { %v825_v51 = vpop.f32.mrf.mxu0 }
 0x297   :  { %v826_v52 = vadd.f32 %v917_v44, %v825_v51 }
 0x298   :  { %v1056_v53 = vpop.f32.mrf.mxu0 }
 0x299   :  { %831 = vmax.xlane.f32.xlu0 %v826_v52 }
 0x29a   :  { %v828_v54 = vpop.f32.mrf.mxu0 }
 0x29c   :  { %v1057_v55 = vpop.f32.mrf.mxu0 }
 0x322   :  { %v832_v56 = vpop.xlane.xlu0 %831 }
 0x323   :  { %v833_v57 = vsub.f32 %v826_v52, %v832_v56 }
 0x325   :  { %v834_v58 = vmul.f32 1.442695, %v833_v57 }
 0x327   :  { %1126 = vpow2.f32 %v834_v58 }
 0x334   :  { %v1127_v59 = vpop.eup %1126 }
 0x335   :  { %836 = vadd.xlane.f32.xlu0 %v1127_v59 }
 0x3be   :  { %v837_v60 = vpop.xlane.xlu0 %836 }
 0x3bf   :  { %1128 = vlog2.f32 %v837_v60 }
 0x3cc   :  { %v1129_v61 = vpop.eup %1128 }
 0x3cd   :  { %v839_v62 = vmul.f32 0.6931472, %v1129_v61 }
 0x3cf   :  { %v840_v63 = vadd.f32 %v839_v62, %v832_v56 }
 0x3d1   :  { %v841_v0 = vsub.f32 %v826_v52, %v840_v63 }
 0x3d3   :  { %842 = vst [vmem:[#allocation2] sm:$0xff] %v841_v0 }
 0x3d4   :  { %1141 = shalt.err (!%p1138_p4)
}
 0x3d5   :  { %852 = dma.vmem_to_hbm [thread:$0]  %s850_s5, 128, %s1453_s7, [#allocation3]  }
 0x3d6   :  { %1150 = dma.done.wait [#allocation3], 128  }
 0x3d7   :  { %1151 = vsyncadd [#allocation3], 4294967168 }
 0x3d8   :  { %856 = vsyncpa [#allocation3], 1 }

</bundles_post_ra>
